<compile_context>
chip_gen: v7x
topology: tpu7x:2x2x1
jax: 0.10.0
libtpu: 0.0.40
codegen_flags: <defaults>
</compile_context>

<pallas_src>
import functools

import jax
import jax.numpy as jnp
from jax.experimental import pallas as pl
from jax.experimental.pallas import tpu as pltpu


# ----------------------------------------------------------------------------
# Kernel
# ----------------------------------------------------------------------------
def encoder_kernel(x_ref, wqkv_ref, bqkv_ref, wo_ref, bo_ref, out_ref,
                   *, batch_block, seq_len):
    """One grid step processes batch_block batch elements (B*L flattened rows).

    x_ref:    (B*L, H)   bf16 flattened tokens
    wqkv_ref: (H, 3*H)   bf16 fused, pre-transposed q/k/v weight
    bqkv_ref: (1, 3*H)   f32 fused q/k/v bias
    wo_ref:   (H, H)     bf16 pre-transposed output projection
    bo_ref:   (1, H)     f32
    out_ref:  (B*L, H)   f32 (input dtype)
    """
    B, L = batch_block, seq_len
    H = x_ref.shape[-1]

    # Fused q/k/v projection: one bf16 MXU matmul, f32 accumulation.
    qkv = jnp.dot(x_ref[...], wqkv_ref[...],
                  preferred_element_type=jnp.float32) + bqkv_ref[...]
    q = qkv[:, :H]
    k = qkv[:, H:2 * H]
    v = qkv[:, 2 * H:]

    # Diagonal of einsum('nlh,nlh->nll', q, k), per row: d_i = <q_i, k_i>.
    d = jnp.sum(q * k, axis=-1, keepdims=True)          # (B*L, 1), f32

    # softmax over a row that is [0, ..., d_i, ..., 0] (the zeros participate):
    #   m_i = max(d_i, 0);  Z_i = exp(d_i - m_i) + (L-1)*exp(-m_i)
    #   a_i = exp(d_i - m_i)/Z_i (diagonal),  b_i = exp(-m_i)/Z_i (off-diagonal)
    m = jnp.maximum(d, 0.0)
    e_diag = jnp.exp(d - m)
    e_off = jnp.exp(-m)
    z = e_diag + (L - 1.0) * e_off
    inv_z = 1.0 / z                                     # exact; only a width-1 column
    a = e_diag * inv_z                                  # (B*L, 1)
    b = e_off * inv_z                                   # (B*L, 1)

    # contexts_i = a_i*v_i + b_i*(sum_j v_j - v_i) = (a_i - b_i)*v_i + b_i*sum_j v_j
    # TODO(synk): if L grows, verify (bundle dump) the reshape/axis-1 sum stays
    # copy-free; otherwise compute the per-batch v-sum with a block-ones MXU matmul.
    v3 = v.reshape(B, L, H)
    v_sum = jnp.sum(v3, axis=1, keepdims=True)          # (B, 1, H)
    ctx3 = (a - b).reshape(B, L, 1) * v3 + b.reshape(B, L, 1) * v_sum
    contexts = ctx3.reshape(B * L, H)

    out = jnp.dot(contexts.astype(wo_ref.dtype), wo_ref[...],
                  preferred_element_type=jnp.float32) + bo_ref[...]
    out_ref[...] = out.astype(out_ref.dtype)


# ----------------------------------------------------------------------------
# Host-side packing / heuristics
# ----------------------------------------------------------------------------
def pack_params(params, hidden_size):
    """One-time host-side packing: transpose nn.Linear weights to (in, out),
    cast to bf16 (MXU-native), fuse q/k/v.  Biases kept f32 (added post-acc)."""
    H = hidden_size
    wq, bq, wk, bk, wv, bv, wo, bo = params

    def wt(w):   # (out, in) -> (in, out), bf16
        return w.T.astype(jnp.bfloat16)

    def bi(b):
        return jnp.reshape(b, (1, H)).astype(jnp.float32)

    w_qkv = jnp.concatenate([wt(wq), wt(wk), wt(wv)], axis=1)   # (H, 3H) bf16
    b_qkv = jnp.concatenate([bi(bq), bi(bk), bi(bv)], axis=1)   # (1, 3H) f32
    return w_qkv, b_qkv, wt(wo), bi(bo)


def _pick_batch_block(N, L, *, target_rows=2048, min_split_rows=256):
    """Pick B (batch elements per grid step).

    * Biggest divisor of N with B*L <= target_rows (fill the MXU M-dim,
      amortize the ~0.35-0.6us per-step pipeline overhead).
    * Row counts must be sublane-legal: B == N (full dim) or B*L % 8 == 0;
      prefer multiples of 16 (bf16 packs 16 sublanes per vreg).
    * Only keep >= 2 grid steps (megacore on 2-TC chips) when each step still
      has >= min_split_rows rows; otherwise one big step wins on every gen.
    """
    cands = []
    for b in range(1, N + 1):
        if N % b:
            continue
        if b != N and (b * L) % 8 != 0:
            continue
        cands.append(b)
    fits = [b for b in cands if b * L <= target_rows] or [min(cands)]
    aligned = [b for b in fits if (b * L) % 16 == 0]
    pool = aligned or fits
    b = max(pool)
    if N // b < 2:
        alts = [c for c in pool if N // c >= 2 and c * L >= min_split_rows]
        if alts:
            b = max(alts)
    return b


def _vmem_limit_bytes(R, H):
    bf16, f32 = 2, 4
    io = 2 * R * H * bf16 + 2 * R * H * f32               # x (bf16) + out (f32), double-buffered
    w = (H * 3 * H + H * H) * bf16 + 4 * H * f32          # packed weights + biases
    tmp = 9 * R * H * f32                                 # qkv/q/k/v/ctx temporaries (generous)
    need = io + 2 * w + tmp + (2 << 20)                   # 2x w: covers non-single-buffered fallback
    cap = 48 << 20                                        # fine for v5e/v6e (128 MiB physical)
    try:
        cap = min(cap, int(0.6 * pltpu.get_tpu_info().vmem_capacity_bytes))
    except Exception:
        cap = min(cap, int(0.6 * (64 << 20)))             # conservative v7x (64 MiB/TC) assumption
    return int(min(max(need, 16 << 20), cap))


# ----------------------------------------------------------------------------
# Forward wrapper
# ----------------------------------------------------------------------------
def encoder_forward(x, packed_params, *, batch_block=None):
    """x: (N, L, H) -> contexts (N, L, H).  packed_params from pack_params()."""
    N, L, H = x.shape
    w_qkv, b_qkv, wo_t, bo = packed_params
    assert w_qkv.shape == (H, 3 * H)

    B = batch_block if batch_block is not None else _pick_batch_block(N, L)
    assert N % B == 0, "batch_block must divide N"
    R = B * L

    # No feature padding: the last block dim equals the full array dim (always
    # legal), so there is no host-side pad / trailing slice HBM pass.  Cast to
    # bf16 once (halves the input DMA bytes; matmul accumulates in f32).
    x_flat = x.reshape(N * L, H).astype(jnp.bfloat16)

    kernel = functools.partial(encoder_kernel, batch_block=B, seq_len=L)
    vmem_limit = _vmem_limit_bytes(R, H)

    def run(single_buffer_weights):
        def wspec(shape):
            # Grid-invariant blocks (constant index_map): single-buffer them.
            if single_buffer_weights:
                return pl.BlockSpec(shape, lambda *_: (0,) * len(shape),
                                    pipeline_mode=pl.Buffered(1))
            return pl.BlockSpec(shape, lambda *_: (0,) * len(shape))

        call = pl.pallas_call(
            kernel,
            out_shape=jax.ShapeDtypeStruct((N * L, H), x.dtype),
            grid_spec=pltpu.PrefetchScalarGridSpec(
                num_scalar_prefetch=0,
                grid=(N // B,),
                in_specs=[
                    pl.BlockSpec((R, H), lambda n: (n, 0)),
                    wspec((H, 3 * H)),
                    wspec((1, 3 * H)),
                    wspec((H, H)),
                    wspec((1, H)),
                ],
                out_specs=pl.BlockSpec((R, H), lambda n: (n, 0)),
            ),
            compiler_params=pltpu.CompilerParams(
                dimension_semantics=("parallel",),
                vmem_limit_bytes=vmem_limit,
            ),
        )
        return call(x_flat, w_qkv, b_qkv, wo_t, bo)

    try:
        out_flat = jax.block_until_ready(run(True))
    except Exception:
        # pipeline_mode=pl.Buffered(1) unsupported in this build — fall back
        # to default double-buffered weight blocks (same semantics).
        out_flat = jax.block_until_ready(run(False))

    return out_flat.reshape(N, L, H)


# ----------------------------------------------------------------------------
# Pure-JAX reference & param init (f32 gold standard, matches the PyTorch module)
# ----------------------------------------------------------------------------
def reference_forward(x, params):
    wq, bq, wk, bk, wv, bv, wo, bo = params
    hp = jax.lax.Precision.HIGHEST
    q = jnp.dot(x, wq.T, precision=hp) + bq
    k = jnp.dot(x, wk.T, precision=hp) + bk
    v = jnp.dot(x, wv.T, precision=hp) + bv
    d = jnp.sum(q * k, axis=-1)                                # (N, L)
    L = x.shape[1]
    sims = d[:, :, None] * jnp.eye(L, dtype=x.dtype)[None]     # diagonal (N, L, L)
    attn = jax.nn.softmax(sims, axis=2)
    contexts = jnp.einsum('nij,njh->nih', attn, v, precision=hp)
    return jnp.dot(contexts, wo.T, precision=hp) + bo


def init_params(key, hidden_size):
    ks = jax.random.split(key, 8)
    scale = 1.0 / jnp.sqrt(hidden_size)

    def lin(kw, kb):
        w = jax.random.uniform(kw, (hidden_size, hidden_size),
                               jnp.float32, -scale, scale)
        b = jax.random.uniform(kb, (1, hidden_size), jnp.float32, -scale, scale)
        return w, b

    wq, bq = lin(ks[0], ks[1])
    wk, bk = lin(ks[2], ks[3])
    wv, bv = lin(ks[4], ks[5])
    wo, bo = lin(ks[6], ks[7])
    return (wq, bq, wk, bk, wv, bv, wo, bo)


if __name__ == "__main__":
    key = jax.random.PRNGKey(0)
    k_x, k_p = jax.random.split(key)

    N, L, H = 2, 8, 32
    x = jax.random.normal(k_x, (N, L, H), dtype=jnp.float32)
    params = init_params(k_p, H)

    packed = pack_params(params, H)          # one-time weight packing (bf16, fused)
    out = encoder_forward(x, packed)
    out = jax.block_until_ready(out)

    ref = reference_forward(x, params)
    assert out.shape == (N, L, H)
    # bf16 MXU matmuls (f32 accumulation) => bf16-level agreement with the f32
    # reference; structural errors would be O(1), far above this tolerance.
    assert jnp.allclose(out, ref, atol=5e-2, rtol=5e-2), "mismatch vs reference"

    print("KERNEL_OK")
</pallas_src>

<mosaic_0001>
module attributes {stable_mosaic.version = 11 : i64} {
  func.func @encoder_kernel(%arg0: i32, %arg1: memref<16x32xbf16, #tpu.memory_space<vmem>>, %arg2: memref<32x96xbf16, #tpu.memory_space<vmem>>, %arg3: memref<1x96xf32, #tpu.memory_space<vmem>>, %arg4: memref<32x32xbf16, #tpu.memory_space<vmem>>, %arg5: memref<1x32xf32, #tpu.memory_space<vmem>>, %arg6: memref<16x32xf32, #tpu.memory_space<vmem>>) attributes {dimension_semantics = [#tpu.dimension_semantics<parallel>], iteration_bounds = array<i64: 1>, scalar_prefetch = 0 : i64, scratch_operands = 0 : i64, tpu.core_type = #tpu.core_type<tc>, window_params = [{transform_indices = @transform_0, window_bounds = array<i64: 16, 32>}, {pipeline_mode = #tpu.pipeline_mode<synchronous>, transform_indices = @transform_1, window_bounds = array<i64: 32, 96>}, {pipeline_mode = #tpu.pipeline_mode<synchronous>, transform_indices = @transform_2, window_bounds = array<i64: 1, 96>}, {pipeline_mode = #tpu.pipeline_mode<synchronous>, transform_indices = @transform_3, window_bounds = array<i64: 32, 32>}, {pipeline_mode = #tpu.pipeline_mode<synchronous>, transform_indices = @transform_4, window_bounds = array<i64: 1, 32>}, {transform_indices = @transform_5, window_bounds = array<i64: 16, 32>}]} {
    %c0 = arith.constant 0 : index
    %c0_0 = arith.constant 0 : index
    %0 = vector.load %arg1[%c0, %c0_0] : memref<16x32xbf16, #tpu.memory_space<vmem>>, vector<16x32xbf16>
    %c0_1 = arith.constant 0 : index
    %c0_2 = arith.constant 0 : index
    %1 = vector.load %arg2[%c0_1, %c0_2] : memref<32x96xbf16, #tpu.memory_space<vmem>>, vector<32x96xbf16>
    %cst = arith.constant dense<0.000000e+00> : vector<16x96xf32>
    %2 = tpu.matmul %0, %1, %cst {dimension_numbers = #tpu.dot_dimension_numbers<[1], [0], [0], [1], [0, 0, 1, 1], [], []>} : vector<16x32xbf16>, vector<32x96xbf16>, vector<16x96xf32> -> vector<16x96xf32>
    %c0_3 = arith.constant 0 : index
    %c0_4 = arith.constant 0 : index
    %3 = vector.load %arg3[%c0_3, %c0_4] : memref<1x96xf32, #tpu.memory_space<vmem>>, vector<1x96xf32>
    %4 = vector.broadcast %3 : vector<1x96xf32> to vector<16x96xf32>
    %5 = arith.addf %2, %4 : vector<16x96xf32>
    %6 = vector.extract_strided_slice %5 {offsets = [0, 0], sizes = [16, 32], strides = [1, 1]} : vector<16x96xf32> to vector<16x32xf32>
    %7 = vector.extract_strided_slice %5 {offsets = [0, 32], sizes = [16, 32], strides = [1, 1]} : vector<16x96xf32> to vector<16x32xf32>
    %8 = vector.extract_strided_slice %5 {offsets = [0, 64], sizes = [16, 32], strides = [1, 1]} : vector<16x96xf32> to vector<16x32xf32>
    %9 = arith.mulf %6, %7 : vector<16x32xf32>
    %cst_5 = arith.constant dense<0.000000e+00> : vector<16xf32>
    %10 = vector.multi_reduction <add>, %9, %cst_5 [1] : vector<16x32xf32> to vector<16xf32>
    %11 = vector.shape_cast %10 : vector<16xf32> to vector<16x1xf32>
    %cst_6 = arith.constant 0.000000e+00 : f32
    %12 = vector.broadcast %cst_6 : f32 to vector<16x1xf32>
    %13 = arith.maximumf %11, %12 : vector<16x1xf32>
    %14 = arith.subf %11, %13 : vector<16x1xf32>
    %15 = math.exp %14 : vector<16x1xf32>
    %cst_7 = arith.constant 0.000000e+00 : f32
    %16 = vector.broadcast %cst_7 : f32 to vector<16x1xf32>
    %17 = arith.subf %16, %13 : vector<16x1xf32>
    %18 = math.exp %17 : vector<16x1xf32>
    %cst_8 = arith.constant 7.000000e+00 : f32
    %19 = vector.broadcast %cst_8 : f32 to vector<16x1xf32>
    %20 = arith.mulf %19, %18 : vector<16x1xf32>
    %21 = arith.addf %15, %20 : vector<16x1xf32>
    %cst_9 = arith.constant 1.000000e+00 : f32
    %22 = vector.broadcast %cst_9 : f32 to vector<16x1xf32>
    %23 = arith.divf %22, %21 : vector<16x1xf32>
    %24 = arith.mulf %15, %23 : vector<16x1xf32>
    %25 = arith.mulf %18, %23 : vector<16x1xf32>
    %26 = vector.shape_cast %8 : vector<16x32xf32> to vector<2x8x32xf32>
    %cst_10 = arith.constant dense<0.000000e+00> : vector<2x32xf32>
    %27 = vector.multi_reduction <add>, %26, %cst_10 [1] : vector<2x8x32xf32> to vector<2x32xf32>
    %28 = vector.shape_cast %27 : vector<2x32xf32> to vector<2x1x32xf32>
    %29 = arith.subf %24, %25 : vector<16x1xf32>
    %30 = vector.shape_cast %29 : vector<16x1xf32> to vector<2x8x1xf32>
    %31 = vector.broadcast %30 : vector<2x8x1xf32> to vector<2x8x32xf32>
    %32 = arith.mulf %31, %26 : vector<2x8x32xf32>
    %33 = vector.shape_cast %25 : vector<16x1xf32> to vector<2x8x1xf32>
    %34 = vector.broadcast %33 : vector<2x8x1xf32> to vector<2x8x32xf32>
    %35 = vector.broadcast %28 : vector<2x1x32xf32> to vector<2x8x32xf32>
    %36 = arith.mulf %34, %35 : vector<2x8x32xf32>
    %37 = arith.addf %32, %36 : vector<2x8x32xf32>
    %38 = vector.shape_cast %37 : vector<2x8x32xf32> to vector<16x32xf32>
    %39 = arith.truncf %38 : vector<16x32xf32> to vector<16x32xbf16>
    %c0_11 = arith.constant 0 : index
    %c0_12 = arith.constant 0 : index
    %40 = vector.load %arg4[%c0_11, %c0_12] : memref<32x32xbf16, #tpu.memory_space<vmem>>, vector<32x32xbf16>
    %cst_13 = arith.constant dense<0.000000e+00> : vector<16x32xf32>
    %41 = tpu.matmul %39, %40, %cst_13 {dimension_numbers = #tpu.dot_dimension_numbers<[1], [0], [0], [1], [0, 0, 1, 1], [], []>} : vector<16x32xbf16>, vector<32x32xbf16>, vector<16x32xf32> -> vector<16x32xf32>
    %c0_14 = arith.constant 0 : index
    %c0_15 = arith.constant 0 : index
    %42 = vector.load %arg5[%c0_14, %c0_15] : memref<1x32xf32, #tpu.memory_space<vmem>>, vector<1x32xf32>
    %43 = vector.broadcast %42 : vector<1x32xf32> to vector<16x32xf32>
    %44 = arith.addf %41, %43 : vector<16x32xf32>
    %c0_16 = arith.constant 0 : index
    %c0_17 = arith.constant 0 : index
    %45 = vector.load %arg6[%c0_16, %c0_17] : memref<16x32xf32, #tpu.memory_space<vmem>>, vector<16x32xf32>
    tpu.vector_store %arg6[%c0_16, %c0_17], %44 {strides = array<i32>} : memref<16x32xf32, #tpu.memory_space<vmem>>, vector<16x32xf32>,
    return
  }
  func.func @transform_0(%arg0: i32) -> (i32, i32) {
    %c0_i32 = arith.constant 0 : i32
    %c0_i32_0 = arith.constant 0 : i32
    return %arg0, %c0_i32 : i32, i32
  }
  func.func @transform_1(%arg0: i32) -> (i32, i32) {
    %c0_i32 = arith.constant 0 : i32
    %c0_i32_0 = arith.constant 0 : i32
    %c0_i32_1 = arith.constant 0 : i32
    return %c0_i32, %c0_i32_0 : i32, i32
  }
  func.func @transform_2(%arg0: i32) -> (i32, i32) {
    %c0_i32 = arith.constant 0 : i32
    %c0_i32_0 = arith.constant 0 : i32
    %c0_i32_1 = arith.constant 0 : i32
    return %c0_i32, %c0_i32_0 : i32, i32
  }
  func.func @transform_3(%arg0: i32) -> (i32, i32) {
    %c0_i32 = arith.constant 0 : i32
    %c0_i32_0 = arith.constant 0 : i32
    %c0_i32_1 = arith.constant 0 : i32
    return %c0_i32, %c0_i32_0 : i32, i32
  }
  func.func @transform_4(%arg0: i32) -> (i32, i32) {
    %c0_i32 = arith.constant 0 : i32
    %c0_i32_0 = arith.constant 0 : i32
    %c0_i32_1 = arith.constant 0 : i32
    return %c0_i32, %c0_i32_0 : i32, i32
  }
  func.func @transform_5(%arg0: i32) -> (i32, i32) {
    %c0_i32 = arith.constant 0 : i32
    %c0_i32_0 = arith.constant 0 : i32
    return %arg0, %c0_i32 : i32, i32
  }
}

module attributes {stable_mosaic.version = 11 : i64} {
  func.func @encoder_kernel(%arg0: i32, %arg1: memref<16x32xbf16, #tpu.memory_space<vmem>>, %arg2: memref<32x96xbf16, #tpu.memory_space<vmem>>, %arg3: memref<1x96xf32, #tpu.memory_space<vmem>>, %arg4: memref<32x32xbf16, #tpu.memory_space<vmem>>, %arg5: memref<1x32xf32, #tpu.memory_space<vmem>>, %arg6: memref<16x32xf32, #tpu.memory_space<vmem>>) attributes {dimension_semantics = [#tpu.dimension_semantics<parallel>], iteration_bounds = array<i64: 1>, scalar_prefetch = 0 : i64, scratch_operands = 0 : i64, tpu.core_type = #tpu.core_type<tc>, window_params = [{transform_indices = @transform_0, window_bounds = array<i64: 16, 32>}, {pipeline_mode = #tpu.pipeline_mode<synchronous>, transform_indices = @transform_1, window_bounds = array<i64: 32, 96>}, {pipeline_mode = #tpu.pipeline_mode<synchronous>, transform_indices = @transform_2, window_bounds = array<i64: 1, 96>}, {pipeline_mode = #tpu.pipeline_mode<synchronous>, transform_indices = @transform_3, window_bounds = array<i64: 32, 32>}, {pipeline_mode = #tpu.pipeline_mode<synchronous>, transform_indices = @transform_4, window_bounds = array<i64: 1, 32>}, {transform_indices = @transform_5, window_bounds = array<i64: 16, 32>}]} {
    %c0 = arith.constant 0 : index
    %c0_0 = arith.constant 0 : index
    %0 = vector.load %arg1[%c0, %c0_0] : memref<16x32xbf16, #tpu.memory_space<vmem>>, vector<16x32xbf16>
    %c0_1 = arith.constant 0 : index
    %c0_2 = arith.constant 0 : index
    %1 = vector.load %arg2[%c0_1, %c0_2] : memref<32x96xbf16, #tpu.memory_space<vmem>>, vector<32x96xbf16>
    %cst = arith.constant dense<0.000000e+00> : vector<16x96xf32>
    %2 = tpu.matmul %0, %1, %cst {dimension_numbers = #tpu.dot_dimension_numbers<[1], [0], [0], [1], [0, 0, 1, 1], [], []>} : vector<16x32xbf16>, vector<32x96xbf16>, vector<16x96xf32> -> vector<16x96xf32>
    %c0_3 = arith.constant 0 : index
    %c0_4 = arith.constant 0 : index
    %3 = vector.load %arg3[%c0_3, %c0_4] : memref<1x96xf32, #tpu.memory_space<vmem>>, vector<1x96xf32>
    %4 = vector.broadcast %3 : vector<1x96xf32> to vector<16x96xf32>
    %5 = arith.addf %2, %4 : vector<16x96xf32>
    %6 = vector.extract_strided_slice %5 {offsets = [0, 0], sizes = [16, 32], strides = [1, 1]} : vector<16x96xf32> to vector<16x32xf32>
    %7 = vector.extract_strided_slice %5 {offsets = [0, 32], sizes = [16, 32], strides = [1, 1]} : vector<16x96xf32> to vector<16x32xf32>
    %8 = vector.extract_strided_slice %5 {offsets = [0, 64], sizes = [16, 32], strides = [1, 1]} : vector<16x96xf32> to vector<16x32xf32>
    %9 = arith.mulf %6, %7 : vector<16x32xf32>
    %cst_5 = arith.constant dense<0.000000e+00> : vector<16xf32>
    %10 = vector.multi_reduction <add>, %9, %cst_5 [1] : vector<16x32xf32> to vector<16xf32>
    %11 = vector.shape_cast %10 : vector<16xf32> to vector<16x1xf32>
    %cst_6 = arith.constant 0.000000e+00 : f32
    %12 = vector.broadcast %cst_6 : f32 to vector<16x1xf32>
    %13 = arith.maximumf %11, %12 : vector<16x1xf32>
    %14 = arith.subf %11, %13 : vector<16x1xf32>
    %15 = math.exp %14 : vector<16x1xf32>
    %cst_7 = arith.constant 0.000000e+00 : f32
    %16 = vector.broadcast %cst_7 : f32 to vector<16x1xf32>
    %17 = arith.subf %16, %13 : vector<16x1xf32>
    %18 = math.exp %17 : vector<16x1xf32>
    %cst_8 = arith.constant 7.000000e+00 : f32
    %19 = vector.broadcast %cst_8 : f32 to vector<16x1xf32>
    %20 = arith.mulf %19, %18 : vector<16x1xf32>
    %21 = arith.addf %15, %20 : vector<16x1xf32>
    %cst_9 = arith.constant 1.000000e+00 : f32
    %22 = vector.broadcast %cst_9 : f32 to vector<16x1xf32>
    %23 = arith.divf %22, %21 : vector<16x1xf32>
    %24 = arith.mulf %15, %23 : vector<16x1xf32>
    %25 = arith.mulf %18, %23 : vector<16x1xf32>
    %26 = vector.shape_cast %8 : vector<16x32xf32> to vector<2x8x32xf32>
    %cst_10 = arith.constant dense<0.000000e+00> : vector<2x32xf32>
    %27 = vector.multi_reduction <add>, %26, %cst_10 [1] : vector<2x8x32xf32> to vector<2x32xf32>
    %28 = vector.shape_cast %27 : vector<2x32xf32> to vector<2x1x32xf32>
    %29 = arith.subf %24, %25 : vector<16x1xf32>
    %30 = vector.shape_cast %29 : vector<16x1xf32> to vector<2x8x1xf32>
    %31 = vector.broadcast %30 : vector<2x8x1xf32> to vector<2x8x32xf32>
    %32 = arith.mulf %31, %26 : vector<2x8x32xf32>
    %33 = vector.shape_cast %25 : vector<16x1xf32> to vector<2x8x1xf32>
    %34 = vector.broadcast %33 : vector<2x8x1xf32> to vector<2x8x32xf32>
    %35 = vector.broadcast %28 : vector<2x1x32xf32> to vector<2x8x32xf32>
    %36 = arith.mulf %34, %35 : vector<2x8x32xf32>
    %37 = arith.addf %32, %36 : vector<2x8x32xf32>
    %38 = vector.shape_cast %37 : vector<2x8x32xf32> to vector<16x32xf32>
    %39 = arith.truncf %38 : vector<16x32xf32> to vector<16x32xbf16>
    %c0_11 = arith.constant 0 : index
    %c0_12 = arith.constant 0 : index
    %40 = vector.load %arg4[%c0_11, %c0_12] : memref<32x32xbf16, #tpu.memory_space<vmem>>, vector<32x32xbf16>
    %cst_13 = arith.constant dense<0.000000e+00> : vector<16x32xf32>
    %41 = tpu.matmul %39, %40, %cst_13 {dimension_numbers = #tpu.dot_dimension_numbers<[1], [0], [0], [1], [0, 0, 1, 1], [], []>} : vector<16x32xbf16>, vector<32x32xbf16>, vector<16x32xf32> -> vector<16x32xf32>
    %c0_14 = arith.constant 0 : index
    %c0_15 = arith.constant 0 : index
    %42 = vector.load %arg5[%c0_14, %c0_15] : memref<1x32xf32, #tpu.memory_space<vmem>>, vector<1x32xf32>
    %43 = vector.broadcast %42 : vector<1x32xf32> to vector<16x32xf32>
    %44 = arith.addf %41, %43 : vector<16x32xf32>
    %c0_16 = arith.constant 0 : index
    %c0_17 = arith.constant 0 : index
    %45 = vector.load %arg6[%c0_16, %c0_17] : memref<16x32xf32, #tpu.memory_space<vmem>>, vector<16x32xf32>
    tpu.vector_store %arg6[%c0_16, %c0_17], %44 {strides = array<i32>} : memref<16x32xf32, #tpu.memory_space<vmem>>, vector<16x32xf32>,
    return
  }
  func.func @transform_0(%arg0: i32) -> (i32, i32) {
    %c0_i32 = arith.constant 0 : i32
    %c0_i32_0 = arith.constant 0 : i32
    return %arg0, %c0_i32 : i32, i32
  }
  func.func @transform_1(%arg0: i32) -> (i32, i32) {
    %c0_i32 = arith.constant 0 : i32
    %c0_i32_0 = arith.constant 0 : i32
    %c0_i32_1 = arith.constant 0 : i32
    return %c0_i32, %c0_i32_0 : i32, i32
  }
  func.func @transform_2(%arg0: i32) -> (i32, i32) {
    %c0_i32 = arith.constant 0 : i32
    %c0_i32_0 = arith.constant 0 : i32
    %c0_i32_1 = arith.constant 0 : i32
    return %c0_i32, %c0_i32_0 : i32, i32
  }
  func.func @transform_3(%arg0: i32) -> (i32, i32) {
    %c0_i32 = arith.constant 0 : i32
    %c0_i32_0 = arith.constant 0 : i32
    %c0_i32_1 = arith.constant 0 : i32
    return %c0_i32, %c0_i32_0 : i32, i32
  }
  func.func @transform_4(%arg0: i32) -> (i32, i32) {
    %c0_i32 = arith.constant 0 : i32
    %c0_i32_0 = arith.constant 0 : i32
    %c0_i32_1 = arith.constant 0 : i32
    return %c0_i32, %c0_i32_0 : i32, i32
  }
  func.func @transform_5(%arg0: i32) -> (i32, i32) {
    %c0_i32 = arith.constant 0 : i32
    %c0_i32_0 = arith.constant 0 : i32
    return %arg0, %c0_i32 : i32, i32
  }
}

</mosaic_0001>

<bundles_post_ra>
// kernel: tpu_custom_call.1
= control target key start
LH: loop header
LB: loop body
LE: loop exit
PB: predicated region body
PF: predicated region fallthrough
CT: control target
= control target key end

     0   :  { %10 = vsyncpa [#allocation3], 0  ;;  %s577_s0 = inlined_call_operand.hbm [shape: bf16[16,32], index: 0, kind: input, shape index: {}]   ;;  %s578_s1 = inlined_call_operand.hbm [shape: bf16[32,96], index: 1, kind: input, shape index: {}]   ;;  %s579_s2 = inlined_call_operand.vmem [shape: f32[1,96], index: 2, kind: input, shape index: {}]   ;;  %s580_s3 = inlined_call_operand.hbm [shape: bf16[32,32], index: 3, kind: input, shape index: {}]   ;;  %s581_s4 = inlined_call_operand.vmem [shape: f32[1,32], index: 4, kind: input, shape index: {}]   ;;  %s582_s5 = inlined_call_operand.hbm [shape: f32[16,32], index: 5, kind: output, shape index: {}]  }
   0x1   :  { %11 = vsyncpa [#allocation6], 0 }
   0x2   :  { %12 = vsyncpa [#allocation4], 0  ;;  %s447_s18 = smov [#allocation5]   ;;  %s448_s20 = smov [#allocation2]  }
   0x3   :  { %s30_s19 = sshll.u32 %s447_s18, 4  ;;  %s18_s21 = sshll.u32 %s448_s20, 4  ;;  %s31_s19 = int_to_ptr.vmem [resolvable:$true] %s30_s19  ;;  %s488_s21 = int_to_ptr.vmem [resolvable:$true] %s18_s21 }
   0x4   :  { %s353_s24 = scalar_lea.hbm %s578_s1, 256 }
   0x5   :  { %p354_p0 = scmp.ne.s32.totalorder %s578_s1, %s353_s24  ;;  %p357_p1 = scmp.lt.u32.totalorder %s353_s24, %s578_s1 }
   0x7   :  { %p359_p2 = pnand %p357_p1, %p354_p0 }
   0x9   :  { %362 = shalt.err (!%p359_p2)
}
   0xa   :  { %s363_s29 = scalar_lea.vmem %s31_s19, 256  ;;  %p368_p4 = scmp.lt.s32.totalorder %s31_s19, %s31_s19 }
   0xb   :  { %p364_p3 = scmp.ne.s32.totalorder %s31_s19, %s363_s29  ;;  %p369_p5 = scmp.lt.s32.totalorder %s363_s29, %s363_s29 }
   0xd   :  { %p370_p6 = por %p369_p5, %p368_p4 }
   0xf   :  { %p371_p7 = pnand %p370_p6, %p364_p3 }
  0x11   :  { %374 = shalt.err (!%p371_p7)
}
  0x12   :  { %s449_s30 = smov 64   ;;  %s450_s6 = smov 4  }
  0x13   :  { %36 = dma.hbm_to_vmem [thread:$0]  %s578_s1, 256, %s31_s19, [#allocation6], %s449_s30, %s449_s30, %s450_s6  }
  0x14   :  { %s375_s11 = scalar_lea.hbm %s577_s0, 128 }
  0x15   :  { %p376_p8 = scmp.ne.s32.totalorder %s577_s0, %s375_s11  ;;  %p379_p9 = scmp.lt.u32.totalorder %s375_s11, %s577_s0 }
  0x17   :  { %p381_p10 = pnand %p379_p9, %p376_p8 }
  0x19   :  { %384 = shalt.err (!%p381_p10)
}
  0x1a   :  { %s385_s16 = scalar_lea.vmem %s488_s21, 128  ;;  %p390_p12 = scmp.lt.s32.totalorder %s488_s21, %s488_s21 }
  0x1b   :  { %p386_p11 = scmp.ne.s32.totalorder %s488_s21, %s385_s16  ;;  %p391_p13 = scmp.lt.s32.totalorder %s385_s16, %s385_s16 }
  0x1d   :  { %p392_p0 = por %p391_p13, %p390_p12 }
  0x1f   :  { %p393_p1 = pnand %p392_p0, %p386_p11 }
  0x21   :  { %396 = shalt.err (!%p393_p1)
}
  0x22   :  { %24 = dma.hbm_to_vmem [thread:$0]  %s577_s0, 128, %s488_s21, [#allocation3], %s449_s30, %s449_s30, %s450_s6  }
  0x23   :  { %s451_s18 = smov [#allocation7]   ;;  %s397_s23 = scalar_lea.hbm %s580_s3, 256 }
  0x24   :  { %s44_s19 = sshll.u32 %s451_s18, 4  ;;  %p398_p2 = scmp.ne.s32.totalorder %s580_s3, %s397_s23  ;;  %s45_s19 = int_to_ptr.vmem [resolvable:$true] %s44_s19 }
  0x25   :  { %p401_p3 = scmp.lt.u32.totalorder %s397_s23, %s580_s3 }
  0x27   :  { %p403_p4 = pnand %p401_p3, %p398_p2 }
  0x29   :  { %406 = shalt.err (!%p403_p4)
}
  0x2a   :  { %s407_s28 = scalar_lea.vmem %s45_s19, 256  ;;  %p412_p6 = scmp.lt.s32.totalorder %s45_s19, %s45_s19 }
  0x2b   :  { %p408_p5 = scmp.ne.s32.totalorder %s45_s19, %s407_s28  ;;  %p413_p7 = scmp.lt.s32.totalorder %s407_s28, %s407_s28 }
  0x2d   :  { %p414_p8 = por %p413_p7, %p412_p6 }
  0x2f   :  { %p415_p9 = pnand %p414_p8, %p408_p5 }
  0x31   :  { %418 = shalt.err (!%p415_p9)
}
  0x32   :  { %50 = dma.hbm_to_vmem [thread:$0]  %s580_s3, 256, %s45_s19, [#allocation6], %s449_s30, %s449_s30, %s450_s6  }
  0x33   :  { %441 = dma.done.wait [#allocation3], 128  }
  0x34   :  { %442 = vsyncadd [#allocation3], 4294967168 }
  0x35   :  { %443 = dma.done.wait [#allocation6], 512  }
  0x36   :  { %444 = vsyncadd [#allocation6], 4294966784  ;;  %v452_v0 = vmov 0.0   ;;  %vm453_vm0 = vmmov 0   ;;  %v336_v1 = vld [vmem:[#allocation5] sm:$0xff]   ;;  %v337_v2 = vld [vmem:[#allocation5 + $0x8] sm:$0xff]  }
  0x37   :  { %309 = vmatprep.subr.bf16.mxu0 %v452_v0  ;;  %313 = vmatprep.mubr.msk.bf16.mxu0 %vm453_vm0, %v452_v0  ;;  %v338_v3 = vld [vmem:[#allocation2] sm:$0xff]   ;;  %vm93_vm1 = vcmask 261120   ;;  %s454_s6 = smov 96   ;;  %v339_v17 = vld [vmem:[#allocation7] sm:$0xff]   ;;  %vm180_vm2 = vcmask 785920   ;;  %s455_s8 = smov [#allocation8]  }
  0x38   :  { %317 = vmatprep.subr.bf16.mxu1 %v452_v0  ;;  %321 = vmatprep.mubr.msk.bf16.mxu1 %vm453_vm0, %v452_v0  ;;  %v294_v4 = vld [vmem:[%s579_s2] ss:$0 sm:$0xff]  ;;  %s281_s9 = sshll.u32 %s455_s8, 4  ;;  %s282_s9 = int_to_ptr.vmem [resolvable:$true] %s281_s9 }
  0x39   :  { %310 = vmatpush3.bf16.msra.mxu0 %v336_v1  ;;  %318 = vmatpush3.bf16.msra.mxu1 %v339_v17  ;;  %v340_v18 = vld [vmem:[#allocation7 + $0x8] sm:$0xff]   ;;  %p424_p11 = scmp.lt.s32.totalorder %s282_s9, %s282_s9 }
  0x3a   :  { %311 = vmatprep.subr.bf16.mxu0 %v452_v0  ;;  %319 = vmatprep.subr.bf16.mxu1 %v452_v0 }
  0x3d   :  { %312 = vmatpush3.bf16.msra.mxu0 %v337_v2  ;;  %320 = vmatpush3.bf16.msra.mxu1 %v340_v18 }
  0x40   :  { %314 = vmatmul.mubr.msk.bf16.vlgmr.msra.gmra.mrb[0].mxu0 %vm93_vm1, %v338_v3 }
 0x113   :  { %v131_v5 = vpop.f32.mrb[0].mxu0 }
 0x114   :  { %v544_v6 = vadd.f32 %v294_v4, %v131_v5  ;;  %v315_v7 = vpop.f32.mrb[1].mxu0  ;;  %v299_v5 = vld [vmem:[%s581_s4] ss:$0 sm:$0xff] }
 0x115   :  { %v134_v8 = vpop.f32.mrb[2].mxu0 }
 0x116   :  { %140 = vrot.lane.b32.xlu0 %v544_v6, %s454_s6  ;;  %v316_v9 = vpop.f32.mrb[3].mxu0  ;;  %v547_v10 = vadd.f32 %v294_v4, %v134_v8  ;;  %v181_v31 = vsel %vm180_vm2, %v544_v6, 0.0 }
 0x117   :  { %v182_v36 = vrot.slane %v181_v31, 4 }
 0x118   :  { %v188_v32 = vsel %vm180_vm2, %v547_v10, 0.0 }
 0x119   :  { %v189_v37 = vrot.slane %v188_v32, 4  ;;  %v183_v42 = vadd.f32 %v182_v36, %v181_v31 }
 0x11a   :  { %142 = vrot.lane.b32.xlu0 %v547_v10, %s454_s6 }
 0x11b   :  { %v190_v43 = vadd.f32 %v189_v37, %v188_v32  ;;  %v184_v45 = vrot.slane %v183_v42, 2 }
 0x11d   :  { %v191_v46 = vrot.slane %v190_v43, 2  ;;  %v185_v47 = vadd.f32 %v184_v45, %v183_v42 }
 0x11f   :  { %v192_v48 = vadd.f32 %v191_v46, %v190_v43  ;;  %v186_v52 = vrot.slane %v185_v47, 1 }
 0x121   :  { %v193_v53 = vrot.slane %v192_v48, 1  ;;  %v187_v58 = vadd.f32 %v186_v52, %v185_v47 }
 0x123   :  { %v194_v59 = vadd.f32 %v193_v53, %v192_v48 }
 0x188   :  { %v141_v11 = vpop.permute.xlu0 %140 }
 0x189   :  { %v146_v12 = vmul.f32 %v141_v11, %v544_v6 }
 0x18b   :  { %v148_v13 = vsel %vm93_vm1, %v146_v12, 0.0 }
 0x18c   :  { %149 = vadd.xlane.f32.xlu1 %v148_v13  ;;  %v143_v14 = vpop.permute.xlu0 %142 }
 0x18d   :  { %v147_v15 = vmul.f32 %v143_v14, %v547_v10 }
 0x18f   :  { %v151_v16 = vsel %vm93_vm1, %v147_v15, 0.0 }
 0x190   :  { %152 = vadd.xlane.f32.xlu1 %v151_v16 }
 0x219   :  { %v150_v19 = vpop.xlane.xlu1 %149 }
 0x21a   :  { %v154_v20 = vmax.f32 %v150_v19, 0.0 }
 0x21c   :  { %v156_v21 = vsub.f32 %v150_v19, %v154_v20  ;;  %v162_v22 = vsub.f32 0.0, %v154_v20 }
 0x21d   :  { %v153_v23 = vpop.xlane.xlu1 %152 }
 0x21e   :  { %v164_v24 = vmul.f32 1.442695, %v162_v22  ;;  %v155_v25 = vmax.f32 %v153_v23, 0.0  ;;  %v158_v26 = vmul.f32 1.442695, %v156_v21 }
 0x220   :  { %v157_v27 = vsub.f32 %v153_v23, %v155_v25  ;;  %v163_v28 = vsub.f32 0.0, %v155_v25  ;;  %341 = vpow2.f32 %v164_v24 }
 0x221   :  { %343 = vpow2.f32 %v158_v26 }
 0x222   :  { %v166_v29 = vmul.f32 1.442695, %v163_v28  ;;  %v160_v30 = vmul.f32 1.442695, %v157_v27 }
 0x224   :  { %345 = vpow2.f32 %v166_v29 }
 0x225   :  { %347 = vpow2.f32 %v160_v30 }
 0x22a   :  { %v342_v33 = vpop.eup %341 }
 0x22b   :  { %v168_v34 = vmul.f32 7.0, %v342_v33  ;;  %v344_v35 = vpop.eup %343 }
 0x22d   :  { %v170_v38 = vadd.f32 %v344_v35, %v168_v34 }
 0x22e   :  { %v346_v39 = vpop.eup %345 }
 0x22f   :  { %349 = vrcp.f32 %v170_v38  ;;  %v169_v40 = vmul.f32 7.0, %v346_v39  ;;  %v348_v41 = vpop.eup %347 }
 0x231   :  { %v171_v44 = vadd.f32 %v348_v41, %v169_v40 }
 0x233   :  { %351 = vrcp.f32 %v171_v44 }
 0x239   :  { %v350_v49 = vpop.eup %349 }
 0x23a   :  { %v176_v50 = vmul.f32 %v350_v49, %v344_v35  ;;  %v178_v51 = vmul.f32 %v350_v49, %v342_v33 }
 0x23c   :  { %v195_v54 = vsub.f32 %v176_v50, %v178_v51  ;;  %v199_v63 = vmul.f32 %v187_v58, %v178_v51 }
 0x23d   :  { %v352_v55 = vpop.eup %351 }
 0x23e   :  { %v177_v56 = vmul.f32 %v352_v55, %v348_v41  ;;  %v179_v57 = vmul.f32 %v352_v55, %v346_v39  ;;  %v197_v61 = vmul.f32 %v195_v54, %v544_v6 }
 0x240   :  { %v196_v60 = vsub.f32 %v177_v56, %v179_v57  ;;  %v200_v0 = vmul.f32 %v194_v59, %v179_v57  ;;  %v201_v1 = vadd.f32 %v199_v63, %v197_v61 }
 0x242   :  { %v198_v62 = vmul.f32 %v196_v60, %v547_v10 }
 0x244   :  { %v202_v2 = vadd.f32 %v200_v0, %v198_v62 }
 0x246   :  { %v203_v3 = vpack.c.bf16 %v202_v2, %v201_v1 }
 0x248   :  { %216 = vrot.lane.b32.xlu0 %v203_v3, %s449_s30  ;;  %s419_s30 = scalar_lea.vmem %s282_s9, 256 }
 0x249   :  { %p420_p10 = scmp.ne.s32.totalorder %s282_s9, %s419_s30  ;;  %p425_p12 = scmp.lt.s32.totalorder %s419_s30, %s419_s30 }
 0x24b   :  { %p426_p13 = por %p425_p12, %p424_p11 }
 0x24d   :  { %p427_p0 = pnand %p426_p13, %p420_p10 }
 0x2ba   :  { %v217_v4 = vpop.permute.xlu0 %216 }
 0x2bb   :  { %322 = vmatmul.mubr.msk.bf16.vlgmr.msra.gmra.mrb[0].mxu1 %vm93_vm1, %v217_v4 }
 0x38e   :  { %v267_v7 = vpop.f32.mrb[0].mxu1 }
 0x38f   :  { %v268_v6 = vadd.f32 %v299_v5, %v267_v7  ;;  %v323_v8 = vpop.f32.mrb[1].mxu1 }
 0x390   :  { %v270_v9 = vpop.f32.mrb[2].mxu1 }
 0x391   :  { %274 = vst.msk [vmem:[#allocation8] sm:$0xff] %vm93_vm1, %v268_v6  ;;  %v271_v10 = vadd.f32 %v299_v5, %v270_v9  ;;  %v324_v11 = vpop.f32.mrb[3].mxu1 }
 0x393   :  { %275 = vst.msk [vmem:[#allocation8 + $0x8] sm:$0xff] %vm93_vm1, %v271_v10 }
 0x394   :  { %430 = shalt.err (!%p427_p0)
}
 0x395   :  { %s431_s11 = scalar_lea.hbm %s582_s5, 256 }
 0x396   :  { %p432_p1 = scmp.ne.s32.totalorder %s582_s5, %s431_s11  ;;  %p435_p2 = scmp.lt.u32.totalorder %s431_s11, %s582_s5 }
 0x398   :  { %p437_p3 = pnand %p435_p2, %p432_p1 }
 0x39a   :  { %440 = shalt.err (!%p437_p3)
}
 0x39b   :  { %s456_s16 = smov 128   ;;  %s457_s1 = smov 8  }
 0x39c   :  { %287 = dma.vmem_to_hbm [thread:$0]  %s282_s9, 256, %s582_s5, [#allocation4], %s456_s16, %s456_s16, %s457_s1  }
 0x39d   :  { %445 = dma.done.wait [#allocation4], 256  }
 0x39e   :  { %446 = vsyncadd [#allocation4], 4294967040 }
 0x39f   :  { %291 = vsyncpa [#allocation3], 1 }
 0x3a0   :  { %292 = vsyncpa [#allocation6], 1 }
 0x3a1   :  { %293 = vsyncpa [#allocation4], 1 }

// kernel: tpu_custom_call.1
= control target key start
LH: loop header
LB: loop body
LE: loop exit
PB: predicated region body
PF: predicated region fallthrough
CT: control target
= control target key end

     0   :  { %10 = vsyncpa [#allocation3], 0  ;;  %s577_s0 = inlined_call_operand.hbm [shape: bf16[16,32], index: 0, kind: input, shape index: {}]   ;;  %s578_s1 = inlined_call_operand.hbm [shape: bf16[32,96], index: 1, kind: input, shape index: {}]   ;;  %s579_s2 = inlined_call_operand.vmem [shape: f32[1,96], index: 2, kind: input, shape index: {}]   ;;  %s580_s3 = inlined_call_operand.hbm [shape: bf16[32,32], index: 3, kind: input, shape index: {}]   ;;  %s581_s4 = inlined_call_operand.vmem [shape: f32[1,32], index: 4, kind: input, shape index: {}]   ;;  %s582_s5 = inlined_call_operand.hbm [shape: f32[16,32], index: 5, kind: output, shape index: {}]  }
   0x1   :  { %11 = vsyncpa [#allocation6], 0 }
   0x2   :  { %12 = vsyncpa [#allocation4], 0  ;;  %s447_s18 = smov [#allocation5]   ;;  %s448_s20 = smov [#allocation2]  }
   0x3   :  { %s30_s19 = sshll.u32 %s447_s18, 4  ;;  %s18_s21 = sshll.u32 %s448_s20, 4  ;;  %s31_s19 = int_to_ptr.vmem [resolvable:$true] %s30_s19  ;;  %s488_s21 = int_to_ptr.vmem [resolvable:$true] %s18_s21 }
   0x4   :  { %s353_s24 = scalar_lea.hbm %s578_s1, 256 }
   0x5   :  { %p354_p0 = scmp.ne.s32.totalorder %s578_s1, %s353_s24  ;;  %p357_p1 = scmp.lt.u32.totalorder %s353_s24, %s578_s1 }
   0x7   :  { %p359_p2 = pnand %p357_p1, %p354_p0 }
   0x9   :  { %362 = shalt.err (!%p359_p2)
}
   0xa   :  { %s363_s29 = scalar_lea.vmem %s31_s19, 256  ;;  %p368_p4 = scmp.lt.s32.totalorder %s31_s19, %s31_s19 }
   0xb   :  { %p364_p3 = scmp.ne.s32.totalorder %s31_s19, %s363_s29  ;;  %p369_p5 = scmp.lt.s32.totalorder %s363_s29, %s363_s29 }
   0xd   :  { %p370_p6 = por %p369_p5, %p368_p4 }
   0xf   :  { %p371_p7 = pnand %p370_p6, %p364_p3 }
  0x11   :  { %374 = shalt.err (!%p371_p7)
}
  0x12   :  { %s449_s30 = smov 64   ;;  %s450_s6 = smov 4  }
  0x13   :  { %36 = dma.hbm_to_vmem [thread:$0]  %s578_s1, 256, %s31_s19, [#allocation6], %s449_s30, %s449_s30, %s450_s6  }
  0x14   :  { %s375_s11 = scalar_lea.hbm %s577_s0, 128 }
  0x15   :  { %p376_p8 = scmp.ne.s32.totalorder %s577_s0, %s375_s11  ;;  %p379_p9 = scmp.lt.u32.totalorder %s375_s11, %s577_s0 }
  0x17   :  { %p381_p10 = pnand %p379_p9, %p376_p8 }
  0x19   :  { %384 = shalt.err (!%p381_p10)
}
  0x1a   :  { %s385_s16 = scalar_lea.vmem %s488_s21, 128  ;;  %p390_p12 = scmp.lt.s32.totalorder %s488_s21, %s488_s21 }
  0x1b   :  { %p386_p11 = scmp.ne.s32.totalorder %s488_s21, %s385_s16  ;;  %p391_p13 = scmp.lt.s32.totalorder %s385_s16, %s385_s16 }
  0x1d   :  { %p392_p0 = por %p391_p13, %p390_p12 }
  0x1f   :  { %p393_p1 = pnand %p392_p0, %p386_p11 }
  0x21   :  { %396 = shalt.err (!%p393_p1)
}
  0x22   :  { %24 = dma.hbm_to_vmem [thread:$0]  %s577_s0, 128, %s488_s21, [#allocation3], %s449_s30, %s449_s30, %s450_s6  }
  0x23   :  { %s451_s18 = smov [#allocation7]   ;;  %s397_s23 = scalar_lea.hbm %s580_s3, 256 }
  0x24   :  { %s44_s19 = sshll.u32 %s451_s18, 4  ;;  %p398_p2 = scmp.ne.s32.totalorder %s580_s3, %s397_s23  ;;  %s45_s19 = int_to_ptr.vmem [resolvable:$true] %s44_s19 }
  0x25   :  { %p401_p3 = scmp.lt.u32.totalorder %s397_s23, %s580_s3 }
  0x27   :  { %p403_p4 = pnand %p401_p3, %p398_p2 }
  0x29   :  { %406 = shalt.err (!%p403_p4)
}
  0x2a   :  { %s407_s28 = scalar_lea.vmem %s45_s19, 256  ;;  %p412_p6 = scmp.lt.s32.totalorder %s45_s19, %s45_s19 }
  0x2b   :  { %p408_p5 = scmp.ne.s32.totalorder %s45_s19, %s407_s28  ;;  %p413_p7 = scmp.lt.s32.totalorder %s407_s28, %s407_s28 }
  0x2d   :  { %p414_p8 = por %p413_p7, %p412_p6 }
  0x2f   :  { %p415_p9 = pnand %p414_p8, %p408_p5 }
  0x31   :  { %418 = shalt.err (!%p415_p9)
}
  0x32   :  { %50 = dma.hbm_to_vmem [thread:$0]  %s580_s3, 256, %s45_s19, [#allocation6], %s449_s30, %s449_s30, %s450_s6  }
  0x33   :  { %441 = dma.done.wait [#allocation3], 128  }
  0x34   :  { %442 = vsyncadd [#allocation3], 4294967168 }
  0x35   :  { %443 = dma.done.wait [#allocation6], 512  }
  0x36   :  { %444 = vsyncadd [#allocation6], 4294966784  ;;  %v452_v0 = vmov 0.0   ;;  %vm453_vm0 = vmmov 0   ;;  %v336_v1 = vld [vmem:[#allocation5] sm:$0xff]   ;;  %v337_v2 = vld [vmem:[#allocation5 + $0x8] sm:$0xff]  }
  0x37   :  { %309 = vmatprep.subr.bf16.mxu0 %v452_v0  ;;  %313 = vmatprep.mubr.msk.bf16.mxu0 %vm453_vm0, %v452_v0  ;;  %v338_v3 = vld [vmem:[#allocation2] sm:$0xff]   ;;  %vm93_vm1 = vcmask 261120   ;;  %s454_s6 = smov 96   ;;  %v339_v17 = vld [vmem:[#allocation7] sm:$0xff]   ;;  %vm180_vm2 = vcmask 785920   ;;  %s455_s8 = smov [#allocation8]  }
  0x38   :  { %317 = vmatprep.subr.bf16.mxu1 %v452_v0  ;;  %321 = vmatprep.mubr.msk.bf16.mxu1 %vm453_vm0, %v452_v0  ;;  %v294_v4 = vld [vmem:[%s579_s2] ss:$0 sm:$0xff]  ;;  %s281_s9 = sshll.u32 %s455_s8, 4  ;;  %s282_s9 = int_to_ptr.vmem [resolvable:$true] %s281_s9 }
  0x39   :  { %310 = vmatpush3.bf16.msra.mxu0 %v336_v1  ;;  %318 = vmatpush3.bf16.msra.mxu1 %v339_v17  ;;  %v340_v18 = vld [vmem:[#allocation7 + $0x8] sm:$0xff]   ;;  %p424_p11 = scmp.lt.s32.totalorder %s282_s9, %s282_s9 }
  0x3a   :  { %311 = vmatprep.subr.bf16.mxu0 %v452_v0  ;;  %319 = vmatprep.subr.bf16.mxu1 %v452_v0 }
  0x3d   :  { %312 = vmatpush3.bf16.msra.mxu0 %v337_v2  ;;  %320 = vmatpush3.bf16.msra.mxu1 %v340_v18 }
  0x40   :  { %314 = vmatmul.mubr.msk.bf16.vlgmr.msra.gmra.mrb[0].mxu0 %vm93_vm1, %v338_v3 }
 0x113   :  { %v131_v5 = vpop.f32.mrb[0].mxu0 }
 0x114   :  { %v544_v6 = vadd.f32 %v294_v4, %v131_v5  ;;  %v315_v7 = vpop.f32.mrb[1].mxu0  ;;  %v299_v5 = vld [vmem:[%s581_s4] ss:$0 sm:$0xff] }
 0x115   :  { %v134_v8 = vpop.f32.mrb[2].mxu0 }
 0x116   :  { %140 = vrot.lane.b32.xlu0 %v544_v6, %s454_s6  ;;  %v316_v9 = vpop.f32.mrb[3].mxu0  ;;  %v547_v10 = vadd.f32 %v294_v4, %v134_v8  ;;  %v181_v31 = vsel %vm180_vm2, %v544_v6, 0.0 }
 0x117   :  { %v182_v36 = vrot.slane %v181_v31, 4 }
 0x118   :  { %v188_v32 = vsel %vm180_vm2, %v547_v10, 0.0 }
 0x119   :  { %v189_v37 = vrot.slane %v188_v32, 4  ;;  %v183_v42 = vadd.f32 %v182_v36, %v181_v31 }
 0x11a   :  { %142 = vrot.lane.b32.xlu0 %v547_v10, %s454_s6 }
 0x11b   :  { %v190_v43 = vadd.f32 %v189_v37, %v188_v32  ;;  %v184_v45 = vrot.slane %v183_v42, 2 }
 0x11d   :  { %v191_v46 = vrot.slane %v190_v43, 2  ;;  %v185_v47 = vadd.f32 %v184_v45, %v183_v42 }
 0x11f   :  { %v192_v48 = vadd.f32 %v191_v46, %v190_v43  ;;  %v186_v52 = vrot.slane %v185_v47, 1 }
 0x121   :  { %v193_v53 = vrot.slane %v192_v48, 1  ;;  %v187_v58 = vadd.f32 %v186_v52, %v185_v47 }
 0x123   :  { %v194_v59 = vadd.f32 %v193_v53, %v192_v48 }
 0x188   :  { %v141_v11 = vpop.permute.xlu0 %140 }
 0x189   :  { %v146_v12 = vmul.f32 %v141_v11, %v544_v6 }
 0x18b   :  { %v148_v13 = vsel %vm93_vm1, %v146_v12, 0.0 }
 0x18c   :  { %149 = vadd.xlane.f32.xlu1 %v148_v13  ;;  %v143_v14 = vpop.permute.xlu0 %142 }
 0x18d   :  { %v147_v15 = vmul.f32 %v143_v14, %v547_v10 }
 0x18f   :  { %v151_v16 = vsel %vm93_vm1, %v147_v15, 0.0 }
 0x190   :  { %152 = vadd.xlane.f32.xlu1 %v151_v16 }
 0x219   :  { %v150_v19 = vpop.xlane.xlu1 %149 }
 0x21a   :  { %v154_v20 = vmax.f32 %v150_v19, 0.0 }
 0x21c   :  { %v156_v21 = vsub.f32 %v150_v19, %v154_v20  ;;  %v162_v22 = vsub.f32 0.0, %v154_v20 }
 0x21d   :  { %v153_v23 = vpop.xlane.xlu1 %152 }
 0x21e   :  { %v164_v24 = vmul.f32 1.442695, %v162_v22  ;;  %v155_v25 = vmax.f32 %v153_v23, 0.0  ;;  %v158_v26 = vmul.f32 1.442695, %v156_v21 }
 0x220   :  { %v157_v27 = vsub.f32 %v153_v23, %v155_v25  ;;  %v163_v28 = vsub.f32 0.0, %v155_v25  ;;  %341 = vpow2.f32 %v164_v24 }
 0x221   :  { %343 = vpow2.f32 %v158_v26 }
 0x222   :  { %v166_v29 = vmul.f32 1.442695, %v163_v28  ;;  %v160_v30 = vmul.f32 1.442695, %v157_v27 }
 0x224   :  { %345 = vpow2.f32 %v166_v29 }
 0x225   :  { %347 = vpow2.f32 %v160_v30 }
 0x22a   :  { %v342_v33 = vpop.eup %341 }
 0x22b   :  { %v168_v34 = vmul.f32 7.0, %v342_v33  ;;  %v344_v35 = vpop.eup %343 }
 0x22d   :  { %v170_v38 = vadd.f32 %v344_v35, %v168_v34 }
 0x22e   :  { %v346_v39 = vpop.eup %345 }
 0x22f   :  { %349 = vrcp.f32 %v170_v38  ;;  %v169_v40 = vmul.f32 7.0, %v346_v39  ;;  %v348_v41 = vpop.eup %347 }
 0x231   :  { %v171_v44 = vadd.f32 %v348_v41, %v169_v40 }
 0x233   :  { %351 = vrcp.f32 %v171_v44 }
 0x239   :  { %v350_v49 = vpop.eup %349 }
 0x23a   :  { %v176_v50 = vmul.f32 %v350_v49, %v344_v35  ;;  %v178_v51 = vmul.f32 %v350_v49, %v342_v33 }
 0x23c   :  { %v195_v54 = vsub.f32 %v176_v50, %v178_v51  ;;  %v199_v63 = vmul.f32 %v187_v58, %v178_v51 }
 0x23d   :  { %v352_v55 = vpop.eup %351 }
 0x23e   :  { %v177_v56 = vmul.f32 %v352_v55, %v348_v41  ;;  %v179_v57 = vmul.f32 %v352_v55, %v346_v39  ;;  %v197_v61 = vmul.f32 %v195_v54, %v544_v6 }
 0x240   :  { %v196_v60 = vsub.f32 %v177_v56, %v179_v57  ;;  %v200_v0 = vmul.f32 %v194_v59, %v179_v57  ;;  %v201_v1 = vadd.f32 %v199_v63, %v197_v61 }
 0x242   :  { %v198_v62 = vmul.f32 %v196_v60, %v547_v10 }
 0x244   :  { %v202_v2 = vadd.f32 %v200_v0, %v198_v62 }
 0x246   :  { %v203_v3 = vpack.c.bf16 %v202_v2, %v201_v1 }
 0x248   :  { %216 = vrot.lane.b32.xlu0 %v203_v3, %s449_s30  ;;  %s419_s30 = scalar_lea.vmem %s282_s9, 256 }
 0x249   :  { %p420_p10 = scmp.ne.s32.totalorder %s282_s9, %s419_s30  ;;  %p425_p12 = scmp.lt.s32.totalorder %s419_s30, %s419_s30 }
 0x24b   :  { %p426_p13 = por %p425_p12, %p424_p11 }
 0x24d   :  { %p427_p0 = pnand %p426_p13, %p420_p10 }
 0x2ba   :  { %v217_v4 = vpop.permute.xlu0 %216 }
 0x2bb   :  { %322 = vmatmul.mubr.msk.bf16.vlgmr.msra.gmra.mrb[0].mxu1 %vm93_vm1, %v217_v4 }
 0x38e   :  { %v267_v7 = vpop.f32.mrb[0].mxu1 }
 0x38f   :  { %v268_v6 = vadd.f32 %v299_v5, %v267_v7  ;;  %v323_v8 = vpop.f32.mrb[1].mxu1 }
 0x390   :  { %v270_v9 = vpop.f32.mrb[2].mxu1 }
 0x391   :  { %274 = vst.msk [vmem:[#allocation8] sm:$0xff] %vm93_vm1, %v268_v6  ;;  %v271_v10 = vadd.f32 %v299_v5, %v270_v9  ;;  %v324_v11 = vpop.f32.mrb[3].mxu1 }
 0x393   :  { %275 = vst.msk [vmem:[#allocation8 + $0x8] sm:$0xff] %vm93_vm1, %v271_v10 }
 0x394   :  { %430 = shalt.err (!%p427_p0)
}
 0x395   :  { %s431_s11 = scalar_lea.hbm %s582_s5, 256 }
 0x396   :  { %p432_p1 = scmp.ne.s32.totalorder %s582_s5, %s431_s11  ;;  %p435_p2 = scmp.lt.u32.totalorder %s431_s11, %s582_s5 }
 0x398   :  { %p437_p3 = pnand %p435_p2, %p432_p1 }
 0x39a   :  { %440 = shalt.err (!%p437_p3)
}
 0x39b   :  { %s456_s16 = smov 128   ;;  %s457_s1 = smov 8  }
 0x39c   :  { %287 = dma.vmem_to_hbm [thread:$0]  %s282_s9, 256, %s582_s5, [#allocation4], %s456_s16, %s456_s16, %s457_s1  }
 0x39d   :  { %445 = dma.done.wait [#allocation4], 256  }
 0x39e   :  { %446 = vsyncadd [#allocation4], 4294967040 }
 0x39f   :  { %291 = vsyncpa [#allocation3], 1 }
 0x3a0   :  { %292 = vsyncpa [#allocation6], 1 }
 0x3a1   :  { %293 = vsyncpa [#allocation4], 1 }

</bundles_post_ra>
